<compile_context>
chip_gen: v7x
topology: tpu7x:2x2x1
jax: 0.10.0
libtpu: 0.0.40
codegen_flags: <defaults>
</compile_context>

<pallas_src>
import math

import jax
import jax.numpy as jnp
from jax.experimental import pallas as pl
from jax.experimental.pallas import tpu as pltpu


def _passthrough_kernel(x_ref, o_ref):
    # Identity pass-through of one tile (the interface defines no fusion op).
    o_ref[...] = x_ref[...]


# ~2 MiB per tile: with input+output each double-buffered this is ~8 MiB of
# VMEM, safe on v7x (32 MiB default scoped limit) and tiny on v5e/v6e, while
# still large enough to amortize the ~0.35 us per-grid-step overhead.
_TILE_BYTES = 2 * 1024 * 1024


def _choose_view(total_elems: int, itemsize: int):
    """Pick a lane-dense (rows, cols) 2D view and a row-block size."""
    cols = 0
    # Prefer the widest lane-dense column count that still leaves the row
    # count a multiple of 8 (so it can be tiled); otherwise any multiple of
    # 128 that divides the flat size.
    for require_rows_mult8 in (True, False):
        for c in (2048, 1024, 512, 256, 128):
            if total_elems % c != 0:
                continue
            if require_rows_mult8 and (total_elems // c) % 8 != 0:
                continue
            cols = c
            break
        if cols:
            break
    if cols == 0:
        return None
    rows = total_elems // cols

    # Largest power-of-two multiple of 8 that divides `rows` and keeps the
    # tile under _TILE_BYTES; if rows is not a multiple of 8, a full-extent
    # row block (block_shape == array dim) is always legal.
    block_rows = rows
    if rows % 8 == 0:
        target_rows = max(8, _TILE_BYTES // (cols * itemsize))
        br = 8
        while br * 2 <= target_rows and rows % (br * 2) == 0:
            br *= 2
        block_rows = br
    return rows, cols, block_rows


@jax.jit
def _dense_passthrough(x: jnp.ndarray) -> jnp.ndarray:
    """Tiled, lane-dense, aliased identity copy through a Pallas TPU kernel."""
    orig_shape = x.shape
    total = x.size
    if total == 0:
        return x
    itemsize = jnp.dtype(x.dtype).itemsize

    view = _choose_view(total, itemsize)
    if view is None:
        # TODO(synk): flat size not a multiple of 128 -> cannot present a
        # lane-dense view; fall back to a single full-array block.
        cols = orig_shape[-1] if x.ndim >= 1 else total
        rows = total // cols
        block_rows = rows
    else:
        rows, cols, block_rows = view

    x2d = x.reshape(rows, cols)
    grid = (rows // block_rows,)

    out2d = pl.pallas_call(
        _passthrough_kernel,
        out_shape=jax.ShapeDtypeStruct((rows, cols), x.dtype),
        grid=grid,
        in_specs=[pl.BlockSpec((block_rows, cols), lambda i: (i, 0))],
        out_specs=pl.BlockSpec((block_rows, cols), lambda i: (i, 0)),
        # Pure identity: alias the output onto the input buffer so no new HBM
        # allocation (and no extra copy when the operand is donatable).
        input_output_aliases={0: 0},
        compiler_params=pltpu.CompilerParams(
            dimension_semantics=("parallel",)),
    )(x2d)

    return out2d.reshape(orig_shape)


class FusionModule:
    """JAX/Pallas counterpart of the abstract FusionModule interface."""

    def __init__(self):
        pass

    def __call__(self, data):
        # TODO(synk): FusionModule.forward is abstract (raises
        # NotImplementedError in PyTorch); no concrete fusion math exists to
        # translate. Concrete subclasses (concat / sum / attention fusion)
        # would add their compute inside the Pallas kernel body. Here each
        # dense entry is passed through the tiled Pallas copy.
        # TODO(synk): ME.SparseTensor entries have no Pallas equivalent and
        # are not handled.
        outputs = {k: _dense_passthrough(v) for k, v in data.items()}
        if len(outputs) == 1:
            return next(iter(outputs.values()))
        return outputs


if __name__ == "__main__":
    key = jax.random.PRNGKey(0)
    # Small dense feature map consistent with a conv backbone output: NCHW.
    x = jax.random.normal(key, (2, 4, 16, 16), dtype=jnp.float32)
    data = {"features": x}

    module = FusionModule()
    y = module(data)
    y = jax.block_until_ready(y)

    # The interface defines no transformation; the dense pass-through must be
    # exactly the input.
    assert y.shape == x.shape and y.dtype == x.dtype
    assert bool(jnp.array_equal(y, x))

    print("KERNEL_OK")
</pallas_src>

<mosaic_0001>
module attributes {stable_mosaic.version = 11 : i64} {
  func.func @_passthrough_kernel(%arg0: i32, %arg1: memref<8x256xf32, #tpu.memory_space<vmem>>, %arg2: memref<8x256xf32, #tpu.memory_space<vmem>>) attributes {dimension_semantics = [#tpu.dimension_semantics<parallel>], iteration_bounds = array<i64: 1>, scalar_prefetch = 0 : i64, scratch_operands = 0 : i64, tpu.core_type = #tpu.core_type<tc>, window_params = [{transform_indices = @transform_0, window_bounds = array<i64: 8, 256>}, {transform_indices = @transform_1, window_bounds = array<i64: 8, 256>}]} {
    %c0 = arith.constant 0 : index
    %c0_0 = arith.constant 0 : index
    %0 = vector.load %arg1[%c0, %c0_0] : memref<8x256xf32, #tpu.memory_space<vmem>>, vector<8x256xf32>
    %c0_1 = arith.constant 0 : index
    %c0_2 = arith.constant 0 : index
    %1 = vector.load %arg2[%c0_1, %c0_2] : memref<8x256xf32, #tpu.memory_space<vmem>>, vector<8x256xf32>
    tpu.vector_store %arg2[%c0_1, %c0_2], %0 {strides = array<i32>} : memref<8x256xf32, #tpu.memory_space<vmem>>, vector<8x256xf32>,
    return
  }
  func.func @transform_0(%arg0: i32) -> (i32, i32) {
    %c0_i32 = arith.constant 0 : i32
    %c0_i32_0 = arith.constant 0 : i32
    return %arg0, %c0_i32 : i32, i32
  }
  func.func @transform_1(%arg0: i32) -> (i32, i32) {
    %c0_i32 = arith.constant 0 : i32
    %c0_i32_0 = arith.constant 0 : i32
    return %arg0, %c0_i32 : i32, i32
  }
}

</mosaic_0001>

<bundles_post_ra>
// kernel: _dense_passthrough.1
= control target key start
LH: loop header
LB: loop body
LE: loop exit
PB: predicated region body
PF: predicated region fallthrough
CT: control target
= control target key end

     0   :  { %s38_s0 = inlined_call_operand.vmem [shape: f32[8,256], index: 0, kind: input, shape index: {}, may-alias: {0,1}]   ;;  %s39_s1 = inlined_call_operand.vmem [shape: f32[8,256], index: 1, kind: output, shape index: {}, may-alias: {0,1}]  }
   0x1   :  { %v8_v0 = vld [vmem:[%s38_s0] sm:$0xff]  ;;  %v9_v1 = vld [vmem:[%s38_s0 + $0x8] sm:$0xff] }
   0x2   :  { %10 = vst [vmem:[%s39_s1] sm:$0xff] %v8_v0  ;;  %11 = vst [vmem:[%s39_s1 + $0x8] sm:$0xff] %v9_v1 }

</bundles_post_ra>
